<compile_context>
chip_gen: v6e
topology: v6e:2x2x1
jax: 0.10.0
libtpu: 0.0.40
codegen_flags: <defaults>
</compile_context>

<pallas_src>
import jax
import jax.numpy as jnp
from jax.experimental import pallas as pl
from jax.experimental.pallas import tpu as pltpu

EPS = 1e-6


def sublayer_connection_kernel(x_ref, w_ref, b_ref, o_ref):
    # x_ref: (TM, D) row tile (f32 or bf16 input; normalize/residual in f32)
    x = x_ref[...].astype(jnp.float32)

    # ----- LayerNorm over last dim (biased variance, eps=1e-6) -----
    mean = jnp.mean(x, axis=-1, keepdims=True)
    centered = x - mean
    var = jnp.mean(centered * centered, axis=-1, keepdims=True)
    xn = centered * jax.lax.rsqrt(var + EPS)
    # (gamma/beta are folded into w_ref/b_ref on the host.)

    # ----- sublayer: Linear(D, D) on the MXU, bf16 inputs, f32 accumulate ---
    y = jnp.dot(xn.astype(jnp.bfloat16), w_ref[...],
                preferred_element_type=jnp.float32)
    y = y + b_ref[...]

    # ----- dropout (eval mode => identity) + residual -----
    # TODO(synk): training-mode dropout would use pltpu.prng_seed /
    # pltpu.stateful_bernoulli; eval-mode nn.Dropout is an identity.
    o_ref[...] = (x + y).astype(o_ref.dtype)


def sublayer_connection(x, gamma, beta, w, b, *, tile_rows=256):
    """x: [B, S, D]. Returns x + Linear(LayerNorm(x)) with eval-mode dropout."""
    B, S, D = x.shape
    rows = B * S
    x2d = x.reshape(rows, D)

    # One-time host-side param prep:
    #   (xn*gamma + beta) @ W + b == xn @ (gamma[:,None]*W) + (beta @ W + b)
    w_f32 = w.astype(jnp.float32)
    w_folded_bf16 = (gamma.astype(jnp.float32)[:, None] * w_f32).astype(jnp.bfloat16)
    b_folded = (beta.astype(jnp.float32) @ w_f32
                + b.astype(jnp.float32)).reshape(1, D)

    # Ragged rows: pad to a multiple of the row tile (padded rows are sliced
    # off afterwards; zero rows are benign for LayerNorm since eps > 0).
    grid_rows = pl.cdiv(rows, tile_rows)
    rows_padded = grid_rows * tile_rows
    if rows_padded != rows:
        x2d = jnp.pad(x2d, ((0, rows_padded - rows), (0, 0)))

    itemsize = jnp.dtype(x.dtype).itemsize
    cost = pl.CostEstimate(
        flops=2 * rows_padded * D * D,
        transcendentals=rows_padded,                    # one rsqrt per row
        bytes_accessed=2 * rows_padded * D * itemsize   # x in + out
        + D * D * 2                                     # bf16 weight
        + D * 4,                                        # f32 bias
    )

    out = pl.pallas_call(
        sublayer_connection_kernel,
        out_shape=jax.ShapeDtypeStruct((rows_padded, D), x.dtype),
        grid_spec=pltpu.PrefetchScalarGridSpec(
            num_scalar_prefetch=0,
            grid=(grid_rows,),
            in_specs=[
                pl.BlockSpec((tile_rows, D), lambda i: (i, 0)),  # x row tile
                pl.BlockSpec((D, D), lambda i: (0, 0)),          # W' (bf16)
                pl.BlockSpec((1, D), lambda i: (0, 0)),          # b' (f32)
            ],
            out_specs=pl.BlockSpec((tile_rows, D), lambda i: (i, 0)),
        ),
        compiler_params=pltpu.CompilerParams(
            dimension_semantics=("parallel",),
            vmem_limit_bytes=64 * 1024 * 1024,
        ),
        cost_estimate=cost,
    )(x2d, w_folded_bf16, b_folded)

    return out[:rows].reshape(B, S, D)


def reference(x, gamma, beta, w, b):
    """Pure-JAX f32 reference matching the PyTorch module (eval mode)."""
    xf = x.astype(jnp.float32)
    mean = jnp.mean(xf, axis=-1, keepdims=True)
    var = jnp.mean((xf - mean) ** 2, axis=-1, keepdims=True)
    xn = (xf - mean) * jax.lax.rsqrt(var + EPS) * gamma + beta
    y = xn @ w.astype(jnp.float32) + b
    return (xf + y).astype(x.dtype)


if __name__ == "__main__":
    # Small but MXU/lane-friendly shapes: D multiple of 128, rows not a
    # multiple of the tile (exercises the padding / cdiv path).
    B, S, D = 2, 200, 128

    key = jax.random.PRNGKey(0)
    kx, kg, kbeta, kw, kb = jax.random.split(key, 5)

    x = jax.random.normal(kx, (B, S, D), dtype=jnp.float32)
    gamma = 1.0 + 0.1 * jax.random.normal(kg, (D,), dtype=jnp.float32)
    beta = 0.1 * jax.random.normal(kbeta, (D,), dtype=jnp.float32)
    w = jax.random.normal(kw, (D, D), dtype=jnp.float32) / jnp.sqrt(D)
    b = 0.01 * jax.random.normal(kb, (D,), dtype=jnp.float32)

    out = sublayer_connection(x, gamma, beta, w, b, tile_rows=256)
    jax.block_until_ready(out)

    ref = reference(x, gamma, beta, w, b)
    # bf16 MXU inputs (f32 accumulate) => looser tolerance than a pure-f32 run.
    assert out.shape == ref.shape, "shape mismatch vs reference"
    assert jnp.allclose(out, ref, atol=5e-2, rtol=5e-2), "mismatch vs reference"

    print("KERNEL_OK")
</pallas_src>

<mosaic_0001>
module attributes {stable_mosaic.version = 11 : i64} {
  func.func @sublayer_connection_kernel(%arg0: i32, %arg1: memref<256x128xf32, #tpu.memory_space<vmem>>, %arg2: memref<128x128xbf16, #tpu.memory_space<vmem>>, %arg3: memref<1x128xf32, #tpu.memory_space<vmem>>, %arg4: memref<256x128xf32, #tpu.memory_space<vmem>>) attributes {dimension_semantics = [#tpu.dimension_semantics<parallel>], iteration_bounds = array<i64: 2>, scalar_prefetch = 0 : i64, scratch_operands = 0 : i64, tpu.core_type = #tpu.core_type<tc>, window_params = [{transform_indices = @transform_0, window_bounds = array<i64: 256, 128>}, {pipeline_mode = #tpu.pipeline_mode<synchronous>, transform_indices = @transform_1, window_bounds = array<i64: 128, 128>}, {pipeline_mode = #tpu.pipeline_mode<synchronous>, transform_indices = @transform_2, window_bounds = array<i64: 1, 128>}, {transform_indices = @transform_3, window_bounds = array<i64: 256, 128>}]} {
    %c0 = arith.constant 0 : index
    %c0_0 = arith.constant 0 : index
    %0 = vector.load %arg1[%c0, %c0_0] : memref<256x128xf32, #tpu.memory_space<vmem>>, vector<256x128xf32>
    %cst = arith.constant dense<0.000000e+00> : vector<256xf32>
    %1 = vector.multi_reduction <add>, %0, %cst [1] : vector<256x128xf32> to vector<256xf32>
    %2 = vector.shape_cast %1 : vector<256xf32> to vector<256x1xf32>
    %cst_1 = arith.constant 1.280000e+02 : f32
    %3 = vector.broadcast %cst_1 : f32 to vector<256x1xf32>
    %4 = arith.divf %2, %3 : vector<256x1xf32>
    %5 = vector.broadcast %4 : vector<256x1xf32> to vector<256x128xf32>
    %6 = arith.subf %0, %5 : vector<256x128xf32>
    %7 = arith.mulf %6, %6 : vector<256x128xf32>
    %cst_2 = arith.constant dense<0.000000e+00> : vector<256xf32>
    %8 = vector.multi_reduction <add>, %7, %cst_2 [1] : vector<256x128xf32> to vector<256xf32>
    %9 = vector.shape_cast %8 : vector<256xf32> to vector<256x1xf32>
    %cst_3 = arith.constant 1.280000e+02 : f32
    %10 = vector.broadcast %cst_3 : f32 to vector<256x1xf32>
    %11 = arith.divf %9, %10 : vector<256x1xf32>
    %cst_4 = arith.constant 9.99999997E-7 : f32
    %12 = vector.broadcast %cst_4 : f32 to vector<256x1xf32>
    %13 = arith.addf %11, %12 : vector<256x1xf32>
    %14 = math.rsqrt %13 : vector<256x1xf32>
    %15 = vector.broadcast %14 : vector<256x1xf32> to vector<256x128xf32>
    %16 = arith.mulf %6, %15 : vector<256x128xf32>
    %17 = arith.truncf %16 : vector<256x128xf32> to vector<256x128xbf16>
    %c0_5 = arith.constant 0 : index
    %c0_6 = arith.constant 0 : index
    %18 = vector.load %arg2[%c0_5, %c0_6] : memref<128x128xbf16, #tpu.memory_space<vmem>>, vector<128x128xbf16>
    %cst_7 = arith.constant dense<0.000000e+00> : vector<256x128xf32>
    %19 = tpu.matmul %17, %18, %cst_7 {dimension_numbers = #tpu.dot_dimension_numbers<[1], [0], [0], [1], [0, 0, 1, 1], [], []>} : vector<256x128xbf16>, vector<128x128xbf16>, vector<256x128xf32> -> vector<256x128xf32>
    %c0_8 = arith.constant 0 : index
    %c0_9 = arith.constant 0 : index
    %20 = vector.load %arg3[%c0_8, %c0_9] : memref<1x128xf32, #tpu.memory_space<vmem>>, vector<1x128xf32>
    %21 = vector.broadcast %20 : vector<1x128xf32> to vector<256x128xf32>
    %22 = arith.addf %19, %21 : vector<256x128xf32>
    %23 = arith.addf %0, %22 : vector<256x128xf32>
    %c0_10 = arith.constant 0 : index
    %c0_11 = arith.constant 0 : index
    %24 = vector.load %arg4[%c0_10, %c0_11] : memref<256x128xf32, #tpu.memory_space<vmem>>, vector<256x128xf32>
    tpu.vector_store %arg4[%c0_10, %c0_11], %23 {strides = array<i32>} : memref<256x128xf32, #tpu.memory_space<vmem>>, vector<256x128xf32>,
    return
  }
  func.func @transform_0(%arg0: i32) -> (i32, i32) {
    %c0_i32 = arith.constant 0 : i32
    %c0_i32_0 = arith.constant 0 : i32
    return %arg0, %c0_i32 : i32, i32
  }
  func.func @transform_1(%arg0: i32) -> (i32, i32) {
    %c0_i32 = arith.constant 0 : i32
    %c0_i32_0 = arith.constant 0 : i32
    %c0_i32_1 = arith.constant 0 : i32
    return %c0_i32, %c0_i32_0 : i32, i32
  }
  func.func @transform_2(%arg0: i32) -> (i32, i32) {
    %c0_i32 = arith.constant 0 : i32
    %c0_i32_0 = arith.constant 0 : i32
    %c0_i32_1 = arith.constant 0 : i32
    return %c0_i32, %c0_i32_0 : i32, i32
  }
  func.func @transform_3(%arg0: i32) -> (i32, i32) {
    %c0_i32 = arith.constant 0 : i32
    %c0_i32_0 = arith.constant 0 : i32
    return %arg0, %c0_i32 : i32, i32
  }
}

</mosaic_0001>

<bundles_post_ra>
// kernel: tpu_custom_call.1
= control target key start
LH: loop header
LB: loop body
LE: loop exit
PB: predicated region body
PF: predicated region fallthrough
CT: control target
= control target key end

     0   :  { %8 = vsyncpa [#allocation3], 0  ;;  %s2037_s0 = inlined_call_operand.hbm [shape: f32[512,128], index: 0, kind: input, shape index: {}]   ;;  %s2038_s1 = inlined_call_operand.hbm [shape: bf16[128,128], index: 1, kind: input, shape index: {}]   ;;  %s2039_s2 = inlined_call_operand.vmem [shape: f32[1,128], index: 2, kind: input, shape index: {}]   ;;  %s2040_s3 = inlined_call_operand.hbm [shape: f32[512,128], index: 3, kind: output, shape index: {}]  }
   0x1   :  { %10 = vsyncpa [#allocation3 + $0x1], 0 }
   0x2   :  { %11 = vsyncpa [#allocation6], 0 }
   0x3   :  { %12 = vsyncpa [#allocation4], 0 }
   0x4   :  { %14 = vsyncpa [#allocation4 + $0x1], 0  ;;  %s1430_s12 = smov 0   ;;  %s1432_s13 = smov 0  }
   0x5   :  { %s1434_s14 = smov 0   ;;  %s1436_s15 = smov 0  }
   0x6 LB: > { %s1451_s16 = sadd.s32 4294967295, %s1399_s15   ;;  %s1001_s17 = sadd.s32 4294967294, %s1399_s15   ;;  %s1399_s15 = sphi %s1436_s15, %s2062_s15   ;;  %s1395_s14 = sphi %s1434_s14, %s2061_s14   ;;  %s1391_s13 = sphi %s1432_s13, %s2060_s13   ;;  %s1387_s12 = sphi %s1430_s12, %s2059_s12  }
   0x7   : > { %p40_p0 = scmp.ne.s32.totalorder %s1391_s13, %s1387_s12  ;;  %p2041_p1 = scmp.eq.s32.totalorder %s1451_s16, 0 }
   0x8   : > { %p112_p3 = scmp.eq.s32.totalorder %s1001_s17, 1  ;;  %p1002_p5 = scmp.ge.s32.totalorder %s1399_s15, 1 }
   0x9   : > { %p1460_p4 = por %p2041_p1, %p40_p0  ;;  %p119_p7 = scmp.lt.s32.totalorder %s1399_s15, 3 }
   0xa   : > { %p1465_p6 = por %p112_p3, %p40_p0  ;;  %s1401_s21 = smov [#allocation5]  }
   0xb   : > { %s2045_s18 = scalar_select %p1460_p4, 1, 0 }
   0xc   : > { %s2046_s19 = scalar_select %p1465_p6, 1, 0 }
   0xd   : > { %p1470_p8 = pnand %p1002_p5, %p119_p7  ;;  %s131_s22 = sshll.u32 %s1401_s21, 4  ;;  %s132_s22 = int_to_ptr.vmem [resolvable:$true] %s131_s22 }
   0xe   : > { %s1484_s24 = sadd.s32 1, %s1399_s15   ;;  %s27_s25 = sadd.s32 1, %s1395_s14 }
   0xf   : > { %s2047_s20 = scalar_select %p1470_p8, 1, 0 }
  0x10   : > { %p1124_p9 = pneg %p1470_p8  ;;  %s24_s26 = ssub.s32 %s1399_s15, %s1484_s24 }
  0x11   : > { %s1288_s27 = scalar_lea.vmem %s132_s22, 1024  ;;  %p1296_p5 = scmp.lt.s32.totalorder %s132_s22, %s132_s22 }
  0x12   : > { %p1479_p11 = pnand %p1124_p9, %p2041_p1  ;;  %p1289_p13 = scmp.ne.s32.totalorder %s132_s22, %s1288_s27 }
  0x13   : > { %p1297_p7 = scmp.lt.s32.totalorder %s1288_s27, %s1288_s27 }
  0x14   : > { %p1279_p12 = pneg %p1479_p11 }
  0x15   : > { %p1298_p10 = por %p1297_p7, %p1296_p5 }
  0x16   : > { %p1291_p0 = pnand %p1289_p13, %p1279_p12 }
  0x18   : > { %p1292_p3 = pneg %p1291_p0 }
  0x1a   : > { %p1299_p2 = pnand %p1298_p10, %p1292_p3 }
  0x1c   : > { %1302 = shalt.err (!%p1299_p2)
}
  0x1d   : > { %s1402_s28 = smov 64   ;;  %s1403_s29 = smov 4  }
  0x1e   : > { %1127 = dma.hbm_to_vmem [thread:$0]  (!%p1479_p11), %s2038_s1, 1024, %s132_s22, [#allocation6], %s1402_s28, %s1402_s28, %s1403_s29  }
  0x1f   : > { %p25_p9 = scmp.eq.s32.totalorder %s24_s26, 0  ;;  %p34_p12 = scmp.ne.s32.totalorder %s1395_s14, %s1391_s13 }
  0x20   : > { %p35_p10 = scmp.eq.s32.totalorder %s1399_s15, 0  ;;  %p1137_p2 = scmp.lt.s32.totalorder %s1399_s15, 2 }
  0x21   : > { %s1501_s5 = scalar_select %p25_p9, %s1395_s14, %s27_s25  }
  0x22   : > { %p36_p13 = por %p35_p10, %p34_p12  ;;  %p2049_p0 = scmp.eq.s32.totalorder %s1451_s16, 1 }
  0x23   : > { %s148_s7 = sand.u32 1, %s1395_s14   ;;  %s1026_s8 = sshll.u32 %s1399_s15, 12 }
  0x24   : > { %p1505_p3 = por %p2049_p0, %p34_p12  ;;  %s1005_s9 = sshll.u32 %s148_s7, 8 }
  0x25   : > { %s1514_s17 = scalar_lea.hbm %s2037_s0, %s1026_s8  ;;  %s152_s21 = scalar_lea.vmem [#allocation2], %s1005_s9 }
  0x26   : > { %s2050_s6 = scalar_select %p1505_p3, 1, 0 }
  0x27   : > { %s159_s22 = sshll.u32 %s152_s21, 4  ;;  %p1516_p11 = pnand %p1137_p2, %p36_p13  ;;  %s1520_s22 = int_to_ptr.vmem [resolvable:$true] %s159_s22 }
  0x28   : > { %s1522_s25 = scalar_lea.sflag [#allocation3], %s148_s7  ;;  %s1303_s26 = scalar_lea.hbm %s1514_s17, 4096 }
  0x29   : > { %p1304_p5 = scmp.ne.s32.totalorder %s1514_s17, %s1303_s26  ;;  %p1305_p7 = pneg %p1516_p11 }
  0x2a   : > { %s1308_s29 = scalar_lea.hbm %s2037_s0, 8192  ;;  %p1309_p10 = scmp.lt.s32.totalorder %s1514_s17, %s2037_s0 }
  0x2b   : > { %p1306_p9 = pnand %p1305_p7, %p1304_p5  ;;  %p1310_p2 = scmp.lt.s32.totalorder %s1308_s29, %s1303_s26 }
  0x2d   : > { %p1307_p12 = pneg %p1306_p9  ;;  %p1311_p13 = por %p1310_p2, %p1309_p10 }
  0x2f   : > { %p1312_p0 = pnand %p1311_p13, %p1307_p12 }
  0x31   : > { %1315 = shalt.err (!%p1312_p0)
}
  0x32   : > { %s1316_s7 = scalar_lea.vmem %s1520_s22, 4096  ;;  %s1404_s8 = smov [#allocation2]  }
  0x33   : > { %p1317_p1 = scmp.ne.s32.totalorder %s1520_s22, %s1316_s7  ;;  %s1321_s9 = sshll.u32 %s1404_s8, 4  ;;  %s1322_s9 = int_to_ptr.vmem [resolvable:$false] %s1321_s9 }
  0x34   : > { %s1323_s10 = scalar_lea.vmem %s1322_s9, 8192  ;;  %p1324_p9 = scmp.lt.s32.totalorder %s1520_s22, %s1322_s9 }
  0x35   : > { %p1319_p6 = pnand %p1317_p1, %p1305_p7  ;;  %p1325_p3 = scmp.lt.s32.totalorder %s1323_s10, %s1316_s7 }
  0x37   : > { %p1320_p5 = pneg %p1319_p6  ;;  %p1326_p4 = por %p1325_p3, %p1324_p9 }
  0x39   : > { %p1327_p8 = pnand %p1326_p4, %p1320_p5 }
  0x3b   : > { %1330 = shalt.err (!%p1327_p8)
}
  0x3c   : > { %s1405_s11 = smov 128   ;;  %s1406_s21 = smov 8  }
  0x3d   : > { %1131 = dma.hbm_to_vmem [thread:$0]  (!%p1516_p11), %s1514_s17, 4096, %s1520_s22, %s1522_s25, %s1405_s11, %s1405_s11, %s1406_s21  }
  0x3e   : > { %p2052_p1 = scmp.ne.s32.totalorder %s2047_s20, 0 }
  0x3f   : > { %s1546_s26 = sand.u32 (!%p2052_p1), 1, %s1391_s13   ;;  %p2053_p4 = scmp.ne.s32.totalorder (!%p2052_p1), %s2045_s18, 0 }
  0x40   : > { %171 = sbr.rel (%p2052_p1) target bundleno = 659 (0x293), region = 32  ;;  %s1009_s27 = sshll.u32 (!%p2052_p1), %s1546_s26, 8 }
  0x41   : > { %s174_s28 = scalar_lea.sflag (!%p2052_p1), [#allocation3], %s1546_s26  ;;  %s1552_s29 = scalar_lea.vmem (!%p2052_p1), [#allocation2], %s1009_s27 }
  0x45   : > { %1374 = dma.done.wait (%p2053_p4), %s174_s28, 4096  }
  0x46   : > { %1376 = vsyncadd (%p2053_p4), %s174_s28, 4294963200  ;;  %p2054_p6 = scmp.eq.s32.totalorder %s1451_s16, 0 }
  0x48   : > { %1378 = dma.done.wait (%p2054_p6), [#allocation6], 1024   ;;  %p2055_p8 = pmov %p2054_p6 }
  0x49   : > { %v1563_v0 = vld [vmem:[%s1552_s29] sm:$0xff]  ;;  %v1571_v2 = vld [vmem:[%s1552_s29 + $0x8] sm:$0xff]  ;;  %v1579_v4 = vld [vmem:[%s1552_s29 + $0x10] sm:$0xff]  ;;  %s1892_s17 = scalar_lea.vmem [#allocation7], %s1009_s27  ;;  %s1027_s22 = sshll.u32 %s1451_s16, 12 }
  0x4a   : > { %1380 = vsyncadd (%p2055_p8), [#allocation6], 4294966272  ;;  %v1566_v1 = vld [vmem:[%s1552_s29 + $0x80] sm:$0xff]  ;;  %239 = vadd.xlane.f32.xlu0 %v1563_v0  ;;  %v1574_v3 = vld [vmem:[%s1552_s29 + $0x88] sm:$0xff]  ;;  %s918_s23 = sshll.u32 %s1892_s17, 4  ;;  %s1989_s4 = scalar_lea.hbm %s2040_s3, %s1027_s22  ;;  %s1991_s23 = int_to_ptr.vmem [resolvable:$true] %s918_s23 }
  0x4b   : > { %271 = vadd.xlane.f32.xlu1 %v1566_v1  ;;  %v1582_v5 = vld [vmem:[%s1552_s29 + $0x18] sm:$0xff]  ;;  %v1587_v6 = vld [vmem:[%s1552_s29 + $0x90] sm:$0xff]  ;;  %v1593_v8 = vld [vmem:[%s1552_s29 + $0x20] sm:$0xff]  ;;  %s905_s16 = scalar_lea.sflag [#allocation4], %s1546_s26  ;;  %s1331_s7 = scalar_lea.vmem %s1991_s23, 4096 }
  0x4c   : > { %v1590_v7 = vld [vmem:[%s1552_s29 + $0x98] sm:$0xff]  ;;  %v1596_v9 = vld [vmem:[%s1552_s29 + $0x28] sm:$0xff]  ;;  %v1603_v10 = vld [vmem:[%s1552_s29 + $0xa0] sm:$0xff]  ;;  %p1332_p3 = scmp.ne.s32.totalorder %s1991_s23, %s1331_s7  ;;  %p2056_p11 = scmp.ne.s32.totalorder %s2050_s6, 0 }
  0x4d   : > { %v1606_v11 = vld [vmem:[%s1552_s29 + $0xa8] sm:$0xff]  ;;  %v1611_v12 = vld [vmem:[%s1552_s29 + $0x30] sm:$0xff]  ;;  %v1614_v13 = vld [vmem:[%s1552_s29 + $0x38] sm:$0xff]  ;;  %s1407_s8 = smov [#allocation7]  }
  0x4e   : > { %241 = vadd.xlane.f32.xlu0 %v1571_v2  ;;  %v1619_v14 = vld [vmem:[%s1552_s29 + $0xb0] sm:$0xff]  ;;  %v1622_v15 = vld [vmem:[%s1552_s29 + $0xb8] sm:$0xff]  ;;  %v1627_v16 = vld [vmem:[%s1552_s29 + $0x40] sm:$0xff]  ;;  %p1333_p7 = pnand %p1332_p3, %p2056_p11  ;;  %s1335_s9 = sshll.u32 %s1407_s8, 4  ;;  %s1336_s9 = int_to_ptr.vmem [resolvable:$false] %s1335_s9 }
  0x4f   : > { %273 = vadd.xlane.f32.xlu1 %v1574_v3  ;;  %v1630_v17 = vld [vmem:[%s1552_s29 + $0x48] sm:$0xff]  ;;  %v1635_v18 = vld [vmem:[%s1552_s29 + $0xc0] sm:$0xff]  ;;  %v1643_v20 = vld [vmem:[%s1552_s29 + $0x50] sm:$0xff]  ;;  %s1337_s10 = scalar_lea.vmem %s1336_s9, 8192  ;;  %p1338_p10 = scmp.lt.s32.totalorder %s1991_s23, %s1336_s9 }
  0x50   : > { %v1638_v19 = vld [vmem:[%s1552_s29 + $0xc8] sm:$0xff]  ;;  %v1646_v21 = vld [vmem:[%s1552_s29 + $0x58] sm:$0xff]  ;;  %v1651_v22 = vld [vmem:[%s1552_s29 + $0xd0] sm:$0xff]  ;;  %p1334_p12 = pneg %p1333_p7  ;;  %p1339_p2 = scmp.lt.s32.totalorder %s1337_s10, %s1331_s7 }
  0x51   : > { %v1654_v23 = vld [vmem:[%s1552_s29 + $0xd8] sm:$0xff]  ;;  %v1659_v24 = vld [vmem:[%s1552_s29 + $0x60] sm:$0xff]  ;;  %v1662_v25 = vld [vmem:[%s1552_s29 + $0x68] sm:$0xff] }
  0x52   : > { %243 = vadd.xlane.f32.xlu0 %v1579_v4  ;;  %v1667_v26 = vld [vmem:[%s1552_s29 + $0xe0] sm:$0xff]  ;;  %v1670_v27 = vld [vmem:[%s1552_s29 + $0xe8] sm:$0xff]  ;;  %v1675_v28 = vld [vmem:[%s1552_s29 + $0x70] sm:$0xff]  ;;  %p1340_p13 = por %p1339_p2, %p1338_p10 }
  0x53   : > { %245 = vadd.xlane.f32.xlu1 %v1582_v5  ;;  %v1678_v29 = vld [vmem:[%s1552_s29 + $0x78] sm:$0xff]  ;;  %v1683_v30 = vld [vmem:[%s1552_s29 + $0xf0] sm:$0xff] }
  0x54   : > { %v1686_v31 = vld [vmem:[%s1552_s29 + $0xf8] sm:$0xff]  ;;  %p1341_p0 = pnand %p1340_p13, %p1334_p12 }
  0x56   : > { %275 = vadd.xlane.f32.xlu0 %v1587_v6 }
  0x57   : > { %277 = vadd.xlane.f32.xlu1 %v1590_v7 }
  0x5a   : > { %247 = vadd.xlane.f32.xlu0 %v1593_v8 }
  0x5b   : > { %249 = vadd.xlane.f32.xlu1 %v1596_v9 }
  0x5e   : > { %279 = vadd.xlane.f32.xlu0 %v1603_v10 }
  0x5f   : > { %281 = vadd.xlane.f32.xlu1 %v1606_v11 }
  0x62   : > { %251 = vadd.xlane.f32.xlu0 %v1611_v12 }
  0x63   : > { %253 = vadd.xlane.f32.xlu1 %v1614_v13 }
  0x66   : > { %283 = vadd.xlane.f32.xlu0 %v1619_v14 }
  0x67   : > { %285 = vadd.xlane.f32.xlu1 %v1622_v15 }
  0x6a   : > { %255 = vadd.xlane.f32.xlu0 %v1627_v16 }
  0x6b   : > { %257 = vadd.xlane.f32.xlu1 %v1630_v17 }
  0x6e   : > { %287 = vadd.xlane.f32.xlu0 %v1635_v18 }
  0x6f   : > { %289 = vadd.xlane.f32.xlu1 %v1638_v19 }
  0x72   : > { %259 = vadd.xlane.f32.xlu0 %v1643_v20 }
  0x73   : > { %261 = vadd.xlane.f32.xlu1 %v1646_v21 }
  0x76   : > { %291 = vadd.xlane.f32.xlu0 %v1651_v22 }
  0x77   : > { %293 = vadd.xlane.f32.xlu1 %v1654_v23 }
  0x7a   : > { %263 = vadd.xlane.f32.xlu0 %v1659_v24 }
  0x7b   : > { %265 = vadd.xlane.f32.xlu1 %v1662_v25 }
  0x7e   : > { %295 = vadd.xlane.f32.xlu0 %v1667_v26 }
  0x7f   : > { %297 = vadd.xlane.f32.xlu1 %v1670_v27 }
  0x82   : > { %267 = vadd.xlane.f32.xlu0 %v1675_v28 }
  0x83   : > { %269 = vadd.xlane.f32.xlu1 %v1678_v29 }
  0x86   : > { %299 = vadd.xlane.f32.xlu0 %v1683_v30 }
  0x87   : > { %301 = vadd.xlane.f32.xlu1 %v1686_v31 }
  0xd3   : > { %v240_v32 = vpop.xlane.xlu0 %239 }
  0xd4   : > { %v272_v33 = vpop.xlane.xlu1 %271  ;;  %v304_v34 = vmul.f32 0.0078125, %v240_v32 }
  0xd5   : > { %v320_v35 = vmul.f32 0.0078125, %v272_v33 }
  0xd6   : > { %v1691_v36 = vsub.f32 %v1563_v0, %v304_v34 }
  0xd7   : > { %v1694_v37 = vsub.f32 %v1566_v1, %v320_v35  ;;  %v242_v38 = vpop.xlane.xlu0 %241 }
  0xd8   : > { %v274_v39 = vpop.xlane.xlu1 %273  ;;  %v305_v40 = vmul.f32 0.0078125, %v242_v38  ;;  %v368_v41 = vmul.f32 %v1691_v36, %v1691_v36 }
  0xd9   : > { %v321_v42 = vmul.f32 0.0078125, %v274_v39  ;;  %v384_v45 = vmul.f32 %v1694_v37, %v1694_v37 }
  0xda   : > { %v1699_v43 = vsub.f32 %v1571_v2, %v305_v40  ;;  %400 = vadd.xlane.f32.xlu0 %v368_v41 }
  0xdb   : > { %v1702_v44 = vsub.f32 %v1574_v3, %v321_v42  ;;  %v244_v46 = vpop.xlane.xlu0 %243  ;;  %v1179_v3 = vld [vmem:[#allocation5 + $0x38] sm:$0xff]  }
  0xdc   : > { %v246_v47 = vpop.xlane.xlu1 %245  ;;  %v306_v48 = vmul.f32 0.0078125, %v244_v46  ;;  %v369_v49 = vmul.f32 %v1699_v43, %v1699_v43  ;;  %1052 = vmatprep.subr.bf16.mxu0 %v1179_v3  ;;  %1100 = vmatprep.subr.bf16.mxu1 %v1179_v3 }
  0xdd   : > { %v307_v50 = vmul.f32 0.0078125, %v246_v47  ;;  %v385_v53 = vmul.f32 %v1702_v44, %v1702_v44  ;;  %1053 = vmatpush3.bf16.msra.mxu0 %v1179_v3  ;;  %1108 = vmatpush3.bf16.msra.mxu1 %v1179_v3 }
  0xde   : > { %v1709_v51 = vsub.f32 %v1579_v4, %v306_v48  ;;  %432 = vadd.xlane.f32.xlu0 %v384_v45  ;;  %402 = vadd.xlane.f32.xlu1 %v369_v49 }
  0xdf   : > { %v1712_v52 = vsub.f32 %v1582_v5, %v307_v50  ;;  %v276_v54 = vpop.xlane.xlu0 %275 }
  0xe0   : > { %v278_v55 = vpop.xlane.xlu1 %277  ;;  %v322_v56 = vmul.f32 0.0078125, %v276_v54  ;;  %v370_v57 = vmul.f32 %v1709_v51, %v1709_v51 }
  0xe1   : > { %v323_v58 = vmul.f32 0.0078125, %v278_v55  ;;  %v371_v61 = vmul.f32 %v1712_v52, %v1712_v52 }
  0xe2   : > { %v1719_v59 = vsub.f32 %v1587_v6, %v322_v56  ;;  %434 = vadd.xlane.f32.xlu1 %v385_v53  ;;  %404 = vadd.xlane.f32.xlu0 %v370_v57 }
  0xe3   : > { %v1722_v60 = vsub.f32 %v1590_v7, %v323_v58  ;;  %v248_v62 = vpop.xlane.xlu0 %247 }
  0xe4   : > { %v250_v63 = vpop.xlane.xlu1 %249  ;;  %v308_v0 = vmul.f32 0.0078125, %v248_v62  ;;  %v386_v1 = vmul.f32 %v1719_v59, %v1719_v59 }
  0xe5   : > { %v309_v2 = vmul.f32 0.0078125, %v250_v63  ;;  %v387_v7 = vmul.f32 %v1722_v60, %v1722_v60 }
  0xe6   : > { %v1729_v32 = vsub.f32 %v1593_v8, %v308_v0  ;;  %406 = vadd.xlane.f32.xlu1 %v371_v61  ;;  %436 = vadd.xlane.f32.xlu0 %v386_v1  ;;  %v1180_v8 = vld [vmem:[#allocation5 + $0x30] sm:$0xff]   ;;  %v1182_v61 = vld [vmem:[#allocation5 + $0x20] sm:$0xff]  }
  0xe7   : > { %v1732_v33 = vsub.f32 %v1596_v9, %v309_v2  ;;  %v280_v34 = vpop.xlane.xlu0 %279  ;;  %1054 = vmatprep.subr.bf16.mxu0 %v1180_v8  ;;  %1101 = vmatprep.subr.bf16.mxu1 %v1180_v8 }
  0xe8   : > { %v282_v35 = vpop.xlane.xlu1 %281  ;;  %v324_v38 = vmul.f32 0.0078125, %v280_v34  ;;  %v372_v39 = vmul.f32 %v1729_v32, %v1729_v32  ;;  %1055 = vmatpush3.bf16.msra.mxu0 %v1180_v8  ;;  %1109 = vmatpush3.bf16.msra.mxu1 %v1180_v8 }
  0xe9   : > { %v325_v40 = vmul.f32 0.0078125, %v282_v35  ;;  %v373_v42 = vmul.f32 %v1732_v33, %v1732_v33  ;;  %v1183_v35 = vld [vmem:[#allocation5 + $0x18] sm:$0xff]  }
  0xea   : > { %v1739_v41 = vsub.f32 %v1603_v10, %v324_v38  ;;  %438 = vadd.xlane.f32.xlu1 %v387_v7  ;;  %408 = vadd.xlane.f32.xlu0 %v372_v39  ;;  %v1181_v10 = vld [vmem:[#allocation5 + $0x28] sm:$0xff]  }
  0xeb   : > { %v1742_v9 = vsub.f32 %v1606_v11, %v325_v40  ;;  %v252_v45 = vpop.xlane.xlu0 %251  ;;  %1056 = vmatprep.subr.bf16.mxu0 %v1181_v10  ;;  %1102 = vmatprep.subr.bf16.mxu1 %v1181_v10 }
  0xec   : > { %v254_v46 = vpop.xlane.xlu1 %253  ;;  %v310_v47 = vmul.f32 0.0078125, %v252_v45  ;;  %v388_v48 = vmul.f32 %v1739_v41, %v1739_v41  ;;  %1057 = vmatpush3.bf16.msra.mxu0 %v1181_v10  ;;  %1110 = vmatpush3.bf16.msra.mxu1 %v1181_v10 }
  0xed   : > { %v311_v49 = vmul.f32 0.0078125, %v254_v46  ;;  %v389_v53 = vmul.f32 %v1742_v9, %v1742_v9  ;;  %1058 = vmatprep.subr.bf16.mxu0 %v1182_v61  ;;  %1103 = vmatprep.subr.bf16.mxu1 %v1182_v61 }
  0xee   : > { %v1749_v50 = vsub.f32 %v1611_v12, %v310_v47  ;;  %410 = vadd.xlane.f32.xlu1 %v373_v42  ;;  %440 = vadd.xlane.f32.xlu0 %v388_v48 }
  0xef   : > { %v1752_v11 = vsub.f32 %v1614_v13, %v311_v49  ;;  %v284_v54 = vpop.xlane.xlu0 %283 }
  0xf0   : > { %v286_v55 = vpop.xlane.xlu1 %285  ;;  %v326_v56 = vmul.f32 0.0078125, %v284_v54  ;;  %v374_v57 = vmul.f32 %v1749_v50, %v1749_v50  ;;  %1059 = vmatpush3.bf16.msra.mxu0 %v1182_v61  ;;  %1111 = vmatpush3.bf16.msra.mxu1 %v1182_v61 }
  0xf1   : > { %v327_v58 = vmul.f32 0.0078125, %v286_v55  ;;  %v375_v0 = vmul.f32 %v1752_v11, %v1752_v11  ;;  %1060 = vmatprep.subr.bf16.mxu0 %v1183_v35  ;;  %1104 = vmatprep.subr.bf16.mxu1 %v1183_v35 }
  0xf2   : > { %v1759_v62 = vsub.f32 %v1619_v14, %v326_v56  ;;  %442 = vadd.xlane.f32.xlu1 %v389_v53  ;;  %412 = vadd.xlane.f32.xlu0 %v374_v57 }
  0xf3   : > { %v1762_v63 = vsub.f32 %v1622_v15, %v327_v58  ;;  %v256_v1 = vpop.xlane.xlu0 %255 }
  0xf4   : > { %v258_v2 = vpop.xlane.xlu1 %257  ;;  %v312_v3 = vmul.f32 0.0078125, %v256_v1  ;;  %v390_v7 = vmul.f32 %v1759_v62, %v1759_v62  ;;  %1061 = vmatpush3.bf16.msra.mxu0 %v1183_v35  ;;  %1112 = vmatpush3.bf16.msra.mxu1 %v1183_v35 }
  0xf5   : > { %v313_v34 = vmul.f32 0.0078125, %v258_v2  ;;  %v391_v39 = vmul.f32 %v1762_v63, %v1762_v63 }
  0xf6   : > { %v1769_v38 = vsub.f32 %v1627_v16, %v312_v3  ;;  %414 = vadd.xlane.f32.xlu1 %v375_v0  ;;  %444 = vadd.xlane.f32.xlu0 %v390_v7  ;;  %v1184_v16 = vld [vmem:[#allocation5 + $0x10] sm:$0xff]  }
  0xf7   : > { %v1772_v15 = vsub.f32 %v1630_v17, %v313_v34  ;;  %v288_v40 = vpop.xlane.xlu0 %287  ;;  %1062 = vmatprep.subr.bf16.mxu0 %v1184_v16  ;;  %1105 = vmatprep.subr.bf16.mxu1 %v1184_v16 }
  0xf8   : > { %v290_v8 = vpop.xlane.xlu1 %289  ;;  %v328_v42 = vmul.f32 0.0078125, %v288_v40  ;;  %v376_v45 = vmul.f32 %v1769_v38, %v1769_v38  ;;  %1063 = vmatpush3.bf16.msra.mxu0 %v1184_v16  ;;  %1113 = vmatpush3.bf16.msra.mxu1 %v1184_v16 }
  0xf9   : > { %v329_v46 = vmul.f32 0.0078125, %v290_v8  ;;  %v377_v48 = vmul.f32 %v1772_v15, %v1772_v15 }
  0xfa   : > { %v1779_v47 = vsub.f32 %v1635_v18, %v328_v42  ;;  %446 = vadd.xlane.f32.xlu1 %v391_v39  ;;  %416 = vadd.xlane.f32.xlu0 %v376_v45  ;;  %v1185_v18 = vld [vmem:[#allocation5 + $0x8] sm:$0xff]  }
  0xfb   : > { %v1782_v17 = vsub.f32 %v1638_v19, %v329_v46  ;;  %v260_v49 = vpop.xlane.xlu0 %259  ;;  %1064 = vmatprep.subr.bf16.mxu0 %v1185_v18  ;;  %1106 = vmatprep.subr.bf16.mxu1 %v1185_v18 }
  0xfc   : > { %v262_v10 = vpop.xlane.xlu1 %261  ;;  %v314_v53 = vmul.f32 0.0078125, %v260_v49  ;;  %v392_v54 = vmul.f32 %v1779_v47, %v1779_v47  ;;  %1065 = vmatpush3.bf16.msra.mxu0 %v1185_v18  ;;  %1114 = vmatpush3.bf16.msra.mxu1 %v1185_v18 }
  0xfd   : > { %v315_v55 = vmul.f32 0.0078125, %v262_v10  ;;  %v393_v57 = vmul.f32 %v1782_v17, %v1782_v17 }
  0xfe   : > { %v1789_v56 = vsub.f32 %v1643_v20, %v314_v53  ;;  %418 = vadd.xlane.f32.xlu1 %v377_v48  ;;  %448 = vadd.xlane.f32.xlu0 %v392_v54  ;;  %v1186_v20 = vld [vmem:[#allocation5] sm:$0xff]  }
  0xff   : > { %v1792_v19 = vsub.f32 %v1646_v21, %v315_v55  ;;  %v292_v58 = vpop.xlane.xlu0 %291  ;;  %1066 = vmatprep.subr.bf16.mxu0 %v1186_v20  ;;  %1107 = vmatprep.subr.bf16.mxu1 %v1186_v20 }
 0x100   : > { %v294_v61 = vpop.xlane.xlu1 %293  ;;  %v330_v0 = vmul.f32 0.0078125, %v292_v58  ;;  %v378_v1 = vmul.f32 %v1789_v56, %v1789_v56  ;;  %1067 = vmatpush3.bf16.msra.mxu0 %v1186_v20  ;;  %1115 = vmatpush3.bf16.msra.mxu1 %v1186_v20 }
 0x101   : > { %v331_v2 = vmul.f32 0.0078125, %v294_v61  ;;  %v379_v7 = vmul.f32 %v1792_v19, %v1792_v19 }
 0x102   : > { %v1799_v3 = vsub.f32 %v1651_v22, %v330_v0  ;;  %450 = vadd.xlane.f32.xlu1 %v393_v57  ;;  %420 = vadd.xlane.f32.xlu0 %v378_v1 }
 0x103   : > { %v1802_v21 = vsub.f32 %v1654_v23, %v331_v2  ;;  %v264_v34 = vpop.xlane.xlu0 %263 }
 0x104   : > { %v266_v35 = vpop.xlane.xlu1 %265  ;;  %v316_v39 = vmul.f32 0.0078125, %v264_v34  ;;  %v394_v40 = vmul.f32 %v1799_v3, %v1799_v3 }
 0x105   : > { %v317_v8 = vmul.f32 0.0078125, %v266_v35  ;;  %v395_v42 = vmul.f32 %v1802_v21, %v1802_v21 }
 0x106   : > { %v1809_v22 = vsub.f32 %v1659_v24, %v316_v39  ;;  %422 = vadd.xlane.f32.xlu1 %v379_v7  ;;  %452 = vadd.xlane.f32.xlu0 %v394_v40 }
 0x107   : > { %v1812_v23 = vsub.f32 %v1662_v25, %v317_v8  ;;  %v296_v45 = vpop.xlane.xlu0 %295 }
 0x108   : > { %v298_v46 = vpop.xlane.xlu1 %297  ;;  %v332_v16 = vmul.f32 0.0078125, %v296_v45  ;;  %v380_v48 = vmul.f32 %v1809_v22, %v1809_v22 }
 0x109   : > { %v333_v49 = vmul.f32 0.0078125, %v298_v46  ;;  %v381_v25 = vmul.f32 %v1812_v23, %v1812_v23 }
 0x10a   : > { %v1819_v10 = vsub.f32 %v1667_v26, %v332_v16  ;;  %454 = vadd.xlane.f32.xlu1 %v395_v42  ;;  %424 = vadd.xlane.f32.xlu0 %v380_v48 }
 0x10b   : > { %v1822_v24 = vsub.f32 %v1670_v27, %v333_v49  ;;  %v268_v53 = vpop.xlane.xlu0 %267 }
 0x10c   : > { %v270_v54 = vpop.xlane.xlu1 %269  ;;  %v318_v55 = vmul.f32 0.0078125, %v268_v53  ;;  %v396_v18 = vmul.f32 %v1819_v10, %v1819_v10 }
 0x10d   : > { %v319_v57 = vmul.f32 0.0078125, %v270_v54  ;;  %v397_v27 = vmul.f32 %v1822_v24, %v1822_v24 }
 0x10e   : > { %v1829_v58 = vsub.f32 %v1675_v28, %v318_v55  ;;  %426 = vadd.xlane.f32.xlu1 %v381_v25  ;;  %456 = vadd.xlane.f32.xlu0 %v396_v18 }
 0x10f   : > { %v1832_v26 = vsub.f32 %v1678_v29, %v319_v57  ;;  %v300_v61 = vpop.xlane.xlu0 %299 }
 0x110   : > { %v302_v0 = vpop.xlane.xlu1 %301  ;;  %v334_v1 = vmul.f32 0.0078125, %v300_v61  ;;  %v382_v2 = vmul.f32 %v1829_v58, %v1829_v58 }
 0x111   : > { %v335_v20 = vmul.f32 0.0078125, %v302_v0  ;;  %v383_v29 = vmul.f32 %v1832_v26, %v1832_v26 }
 0x112   : > { %v1839_v7 = vsub.f32 %v1683_v30, %v334_v1  ;;  %458 = vadd.xlane.f32.xlu1 %v397_v27  ;;  %428 = vadd.xlane.f32.xlu0 %v382_v2 }
 0x113   : > { %v1842_v28 = vsub.f32 %v1686_v31, %v335_v20 }
 0x114   : > { %v398_v34 = vmul.f32 %v1839_v7, %v1839_v7 }
 0x115   : > { %v399_v35 = vmul.f32 %v1842_v28, %v1842_v28 }
 0x116   : > { %430 = vadd.xlane.f32.xlu1 %v383_v29  ;;  %460 = vadd.xlane.f32.xlu0 %v398_v34 }
 0x11a   : > { %462 = vadd.xlane.f32.xlu1 %v399_v35 }
 0x163   : > { %v401_v39 = vpop.xlane.xlu0 %400 }
 0x164   : > { %v464_v30 = vmul.f32 0.0078125, %v401_v39 }
 0x166   : > { %v496_v40 = vadd.f32 1e-06, %v464_v30 }
 0x167   : > { %v403_v8 = vpop.xlane.xlu1 %402  ;;  %v433_v42 = vpop.xlane.xlu0 %432 }
 0x168   : > { %v465_v45 = vmul.f32 0.0078125, %v403_v8  ;;  %v480_v31 = vmul.f32 0.0078125, %v433_v42  ;;  %1187 = vrsqrt.f32 %v496_v40 }
 0x16a   : > { %v497_v46 = vadd.f32 1e-06, %v465_v45  ;;  %v512_v16 = vadd.f32 1e-06, %v480_v31 }
 0x16b   : > { %v435_v48 = vpop.xlane.xlu1 %434  ;;  %v405_v49 = vpop.xlane.xlu0 %404 }
 0x16c   : > { %1189 = vrsqrt.f32 %v497_v46  ;;  %v481_v25 = vmul.f32 0.0078125, %v435_v48  ;;  %v466_v53 = vmul.f32 0.0078125, %v405_v49 }
 0x16d   : > { %1191 = vrsqrt.f32 %v512_v16 }
 0x16e   : > { %v513_v54 = vadd.f32 1e-06, %v481_v25  ;;  %v498_v55 = vadd.f32 1e-06, %v466_v53 }
 0x16f   : > { %v407_v18 = vpop.xlane.xlu1 %406  ;;  %v437_v57 = vpop.xlane.xlu0 %436 }
 0x170   : > { %1193 = vrsqrt.f32 %v513_v54  ;;  %v467_v27 = vmul.f32 0.0078125, %v407_v18  ;;  %v482_v61 = vmul.f32 0.0078125, %v437_v57 }
 0x171   : > { %1195 = vrsqrt.f32 %v498_v55 }
 0x172   : > { %v499_v0 = vadd.f32 1e-06, %v467_v27  ;;  %v514_v1 = vadd.f32 1e-06, %v482_v61 }
 0x173   : > { %v439_v2 = vpop.xlane.xlu1 %438  ;;  %v409_v20 = vpop.xlane.xlu0 %408 }
 0x174   : > { %1197 = vrsqrt.f32 %v499_v0  ;;  %v483_v29 = vmul.f32 0.0078125, %v439_v2  ;;  %v468_v34 = vmul.f32 0.0078125, %v409_v20 }
 0x175   : > { %v1188_v35 = vpop.eup %1187  ;;  %1199 = vrsqrt.f32 %v514_v1 }
 0x176   : > { %v515_v39 = vadd.f32 1e-06, %v483_v29  ;;  %v500_v30 = vadd.f32 1e-06, %v468_v34  ;;  %v560_v46 = vmul.f32 %v1188_v35, %v1691_v36 }
 0x177   : > { %v411_v40 = vpop.xlane.xlu1 %410  ;;  %v441_v8 = vpop.xlane.xlu0 %440 }
 0x178   : > { %1201 = vrsqrt.f32 %v515_v39  ;;  %v469_v42 = vmul.f32 0.0078125, %v411_v40  ;;  %v484_v45 = vmul.f32 0.0078125, %v441_v8 }
 0x179   : > { %v1190_v31 = vpop.eup %1189  ;;  %1203 = vrsqrt.f32 %v500_v30 }
 0x17a   : > { %v1192_v16 = vpop.eup %1191  ;;  %v501_v48 = vadd.f32 1e-06, %v469_v42  ;;  %v516_v49 = vadd.f32 1e-06, %v484_v45  ;;  %v561_v25 = vmul.f32 %v1190_v31, %v1699_v43 }
 0x17b   : > { %v443_v53 = vpop.xlane.xlu1 %442  ;;  %v413_v54 = vpop.xlane.xlu0 %412  ;;  %v576_v61 = vmul.f32 %v1192_v16, %v1694_v37 }
 0x17c   : > { %1205 = vrsqrt.f32 %v501_v48  ;;  %v485_v55 = vmul.f32 0.0078125, %v443_v53  ;;  %v470_v18 = vmul.f32 0.0078125, %v413_v54  ;;  %v592_v57 = vpack.c.bf16 %v561_v25, %v560_v46 }
 0x17d   : > { %v1194_v27 = vpop.eup %1193  ;;  %1207 = vrsqrt.f32 %v516_v49 }
 0x17e   : > { %v1196_v0 = vpop.eup %1195  ;;  %v517_v1 = vadd.f32 1e-06, %v485_v55  ;;  %v502_v2 = vadd.f32 1e-06, %v470_v18  ;;  %1068 = vmatprep.mubr.bf16.mxu0 %v592_v57  ;;  %v577_v36 = vmul.f32 %v1194_v27, %v1702_v44 }
 0x17f   : > { %v415_v20 = vpop.xlane.xlu1 %414  ;;  %v445_v29 = vpop.xlane.xlu0 %444  ;;  %v562_v30 = vmul.f32 %v1196_v0, %v1709_v51 }
 0x180   : > { %1209 = vrsqrt.f32 %v517_v1  ;;  %v471_v43 = vmul.f32 0.0078125, %v415_v20  ;;  %v486_v34 = vmul.f32 0.0078125, %v445_v29  ;;  %v600_v35 = vpack.c.bf16 %v577_v36, %v576_v61 }
 0x181   : > { %v1198_v39 = vpop.eup %1197  ;;  %1211 = vrsqrt.f32 %v502_v2 }
 0x182   : > { %v503_v40 = vadd.f32 1e-06, %v471_v43  ;;  %v518_v8 = vadd.f32 1e-06, %v486_v34  ;;  %1084 = vmatprep.mubr.bf16.mxu1 %v600_v35  ;;  %v563_v37 = vmul.f32 %v1198_v39, %v1712_v52  ;;  %v1200_v42 = vpop.eup %1199 }
 0x183   : > { %v447_v45 = vpop.xlane.xlu1 %446  ;;  %v417_v31 = vpop.xlane.xlu0 %416  ;;  %v578_v51 = vmul.f32 %v1200_v42, %v1719_v59 }
 0x184   : > { %1213 = vrsqrt.f32 %v503_v40  ;;  %v487_v44 = vmul.f32 0.0078125, %v447_v45  ;;  %v472_v46 = vmul.f32 0.0078125, %v417_v31  ;;  %v593_v16 = vpack.c.bf16 %v563_v37, %v562_v30 }
 0x185   : > { %v1202_v48 = vpop.eup %1201  ;;  %1215 = vrsqrt.f32 %v518_v8 }
 0x186   : > { %v519_v49 = vadd.f32 1e-06, %v487_v44  ;;  %v504_v25 = vadd.f32 1e-06, %v472_v46  ;;  %1069 = vmatmul.mubr.bf16.vlgmr.msra.gmra.mxu0 %v593_v16  ;;  %v579_v53 = vmul.f32 %v1202_v48, %v1722_v60  ;;  %v1204_v54 = vpop.eup %1203 }
 0x187   : > { %v419_v55 = vpop.xlane.xlu1 %418  ;;  %v449_v18 = vpop.xlane.xlu0 %448  ;;  %v564_v2 = vmul.f32 %v1204_v54, %v1729_v32 }
 0x188   : > { %1217 = vrsqrt.f32 %v519_v49  ;;  %v473_v52 = vmul.f32 0.0078125, %v419_v55  ;;  %v488_v57 = vmul.f32 0.0078125, %v449_v18  ;;  %v601_v27 = vpack.c.bf16 %v579_v53, %v578_v51 }
 0x189   : > { %v1206_v61 = vpop.eup %1205  ;;  %1219 = vrsqrt.f32 %v504_v25 }
 0x18a   : > { %v505_v0 = vadd.f32 1e-06, %v473_v52  ;;  %v520_v1 = vadd.f32 1e-06, %v488_v57  ;;  %1085 = vmatmul.mubr.bf16.vlgmr.msra.gmra.mxu1 %v601_v27  ;;  %v565_v36 = vmul.f32 %v1206_v61, %v1732_v33  ;;  %v1208_v20 = vpop.eup %1207 }
 0x18b   : > { %v451_v59 = vpop.xlane.xlu1 %450  ;;  %v421_v29 = vpop.xlane.xlu0 %420  ;;  %v580_v40 = vmul.f32 %v1208_v20, %v1739_v41 }
 0x18c   : > { %1221 = vrsqrt.f32 %v505_v0  ;;  %v489_v60 = vmul.f32 0.0078125, %v451_v59  ;;  %v474_v43 = vmul.f32 0.0078125, %v421_v29  ;;  %v594_v34 = vpack.c.bf16 %v565_v36, %v564_v2 }
 0x18d   : > { %v1210_v35 = vpop.eup %1209  ;;  %1223 = vrsqrt.f32 %v520_v1 }
 0x18e   : > { %v521_v39 = vadd.f32 1e-06, %v489_v60  ;;  %v506_v30 = vadd.f32 1e-06, %v474_v43  ;;  %1072 = vmatprep.mubr.bf16.mxu0 %v594_v34  ;;  %v581_v8 = vmul.f32 %v1210_v35, %v1742_v9  ;;  %v1212_v37 = vpop.eup %1211 }
 0x18f   : > { %v423_v32 = vpop.xlane.xlu1 %422  ;;  %v453_v42 = vpop.xlane.xlu0 %452  ;;  %v566_v49 = vmul.f32 %v1212_v37, %v1749_v50 }
 0x190   : > { %1225 = vrsqrt.f32 %v521_v39  ;;  %v475_v33 = vmul.f32 0.0078125, %v423_v32  ;;  %v490_v45 = vmul.f32 0.0078125, %v453_v42  ;;  %v602_v31 = vpack.c.bf16 %v581_v8, %v580_v40 }
 0x191   : > { %v1214_v44 = vpop.eup %1213  ;;  %1227 = vrsqrt.f32 %v506_v30 }
 0x192   : > { %v1216_v46 = vpop.eup %1215  ;;  %v507_v16 = vadd.f32 1e-06, %v475_v33  ;;  %v522_v48 = vadd.f32 1e-06, %v490_v45  ;;  %1088 = vmatprep.mubr.bf16.mxu1 %v602_v31  ;;  %v567_v25 = vmul.f32 %v1214_v44, %v1752_v11 }
 0x193   : > { %v455_v41 = vpop.xlane.xlu1 %454  ;;  %v425_v51 = vpop.xlane.xlu0 %424  ;;  %v582_v18 = vmul.f32 %v1216_v46, %v1759_v62 }
 0x194   : > { %1229 = vrsqrt.f32 %v507_v16  ;;  %v491_v9 = vmul.f32 0.0078125, %v455_v41  ;;  %v476_v53 = vmul.f32 0.0078125, %v425_v51  ;;  %v595_v54 = vpack.c.bf16 %v567_v25, %v566_v49 }
 0x195   : > { %v1218_v55 = vpop.eup %1217  ;;  %1231 = vrsqrt.f32 %v522_v48 }
 0x196   : > { %v1220_v52 = vpop.eup %1219  ;;  %v523_v57 = vadd.f32 1e-06, %v491_v9  ;;  %v508_v27 = vadd.f32 1e-06, %v476_v53  ;;  %1073 = vmatmul.mubr.bf16.gmra.mxu0 %v595_v54  ;;  %v583_v61 = vmul.f32 %v1218_v55, %v1762_v63 }
 0x197   : > { %v427_v0 = vpop.xlane.xlu1 %426  ;;  %v457_v50 = vpop.xlane.xlu0 %456  ;;  %v568_v20 = vmul.f32 %v1220_v52, %v1769_v38 }
 0x198   : > { %1233 = vrsqrt.f32 %v523_v57  ;;  %v477_v11 = vmul.f32 0.0078125, %v427_v0  ;;  %v492_v1 = vmul.f32 0.0078125, %v457_v50  ;;  %v603_v2 = vpack.c.bf16 %v583_v61, %v582_v18 }
 0x199   : > { %v1222_v36 = vpop.eup %1221  ;;  %1235 = vrsqrt.f32 %v508_v27 }
 0x19a   : > { %v1224_v59 = vpop.eup %1223  ;;  %v509_v29 = vadd.f32 1e-06, %v477_v11  ;;  %v524_v62 = vadd.f32 1e-06, %v492_v1  ;;  %1089 = vmatmul.mubr.bf16.gmra.mxu1 %v603_v2  ;;  %v569_v60 = vmul.f32 %v1222_v36, %v1772_v15 }
 0x19b   : > { %v459_v43 = vpop.xlane.xlu1 %458  ;;  %v429_v34 = vpop.xlane.xlu0 %428  ;;  %v584_v40 = vmul.f32 %v1224_v59, %v1779_v47 }
 0x19c   : > { %1237 = vrsqrt.f32 %v509_v29  ;;  %v493_v63 = vmul.f32 0.0078125, %v459_v43  ;;  %v478_v35 = vmul.f32 0.0078125, %v429_v34  ;;  %v596_v39 = vpack.c.bf16 %v569_v60, %v568_v20 }
 0x19d   : > { %v1226_v30 = vpop.eup %1225  ;;  %1239 = vrsqrt.f32 %v524_v62 }
 0x19e   : > { %v1228_v8 = vpop.eup %1227  ;;  %v525_v37 = vadd.f32 1e-06, %v493_v63  ;;  %v510_v38 = vadd.f32 1e-06, %v478_v35  ;;  %1076 = vmatprep.mubr.bf16.mxu0 %v596_v39  ;;  %v585_v32 = vmul.f32 %v1226_v30, %v1782_v17 }
 0x19f   : > { %v431_v42 = vpop.xlane.xlu1 %430  ;;  %v461_v33 = vpop.xlane.xlu0 %460  ;;  %v570_v46 = vmul.f32 %v1228_v8, %v1789_v56 }
 0x1a0   : > { %1241 = vrsqrt.f32 %v525_v37  ;;  %v479_v15 = vmul.f32 0.0078125, %v431_v42  ;;  %v494_v45 = vmul.f32 0.0078125, %v461_v33  ;;  %v604_v31 = vpack.c.bf16 %v585_v32, %v584_v40  ;;  %v1252_v32 = vld [vmem:[%s1552_s29 + $0x8] sm:$0xff]  ;;  %v1253_v33 = vld [vmem:[%s1552_s29 + $0x80] sm:$0xff] }
 0x1a1   : > { %v1230_v44 = vpop.eup %1229  ;;  %1243 = vrsqrt.f32 %v510_v38 }
 0x1a2   : > { %v511_v16 = vadd.f32 1e-06, %v479_v15  ;;  %v526_v48 = vadd.f32 1e-06, %v494_v45  ;;  %1092 = vmatprep.mubr.bf16.mxu1 %v604_v31  ;;  %v571_v47 = vmul.f32 %v1230_v44, %v1792_v19  ;;  %v1232_v49 = vpop.eup %1231 }
 0x1a3   : > { %v463_v25 = vpop.xlane.xlu1 %462  ;;  %v586_v53 = vmul.f32 %v1232_v49, %v1799_v3 }
 0x1a4   : > { %1245 = vrsqrt.f32 %v511_v16  ;;  %v495_v41 = vmul.f32 0.0078125, %v463_v25  ;;  %v597_v17 = vpack.c.bf16 %v571_v47, %v570_v46  ;;  %v1255_v46 = vld [vmem:[%s1552_s29 + $0x88] sm:$0xff] }
 0x1a5   : > { %v1234_v51 = vpop.eup %1233  ;;  %1247 = vrsqrt.f32 %v526_v48 }
 0x1a6   : > { %v527_v9 = vadd.f32 1e-06, %v495_v41  ;;  %1077 = vmatmul.mubr.bf16.gmra.mxu0 %v597_v17  ;;  %v587_v54 = vmul.f32 %v1234_v51, %v1802_v21  ;;  %v1236_v56 = vpop.eup %1235 }
 0x1a7   : > { %v572_v19 = vmul.f32 %v1236_v56, %v1809_v22 }
 0x1a8   : > { %1249 = vrsqrt.f32 %v527_v9  ;;  %v605_v55 = vpack.c.bf16 %v587_v54, %v586_v53  ;;  %v1256_v9 = vld [vmem:[%s1552_s29 + $0x20] sm:$0xff] }
 0x1a9   : > { %v1238_v18 = vpop.eup %1237 }
 0x1aa   : > { %1093 = vmatmul.mubr.bf16.gmra.mxu1 %v605_v55  ;;  %v573_v52 = vmul.f32 %v1238_v18, %v1812_v23  ;;  %v1240_v57 = vpop.eup %1239 }
 0x1ab   : > { %v588_v0 = vmul.f32 %v1240_v57, %v1819_v10 }
 0x1ac   : > { %v598_v27 = vpack.c.bf16 %v573_v52, %v572_v19 }
 0x1ad   : > { %v1242_v61 = vpop.eup %1241 }
 0x1ae   : > { %1080 = vmatprep.mubr.bf16.mxu0 %v598_v27  ;;  %v589_v50 = vmul.f32 %v1242_v61, %v1822_v24  ;;  %v1244_v3 = vpop.eup %1243  ;;  %v1885_v24 = vld [vmem:[%s2039_s2] ss:$0 sm:$0xff]  ;;  %v1257_v61 = vld [vmem:[%s1552_s29 + $0x28] sm:$0xff] }
 0x1af   : > { %v574_v1 = vmul.f32 %v1244_v3, %v1829_v58 }
 0x1b0   : > { %v606_v11 = vpack.c.bf16 %v589_v50, %v588_v0  ;;  %v1258_v50 = vld [vmem:[%s1552_s29 + $0xa0] sm:$0xff] }
 0x1b1   : > { %v1246_v21 = vpop.eup %1245 }
 0x1b2   : > { %1096 = vmatprep.mubr.bf16.mxu1 %v606_v11  ;;  %v575_v2 = vmul.f32 %v1246_v21, %v1832_v26  ;;  %v1248_v36 = vpop.eup %1247 }
 0x1b3   : > { %v590_v20 = vmul.f32 %v1248_v36, %v1839_v7  ;;  %v1251_v7 = vld [vmem:[%s1552_s29] sm:$0xff] }
 0x1b4   : > { %v599_v22 = vpack.c.bf16 %v575_v2, %v574_v1  ;;  %v1260_v2 = vld [vmem:[%s1552_s29 + $0xa8] sm:$0xff] }
 0x1b5   : > { %v1250_v23 = vpop.eup %1249 }
 0x1b6   : > { %1081 = vmatmul.mubr.bf16.gmra.mxu0 %v599_v22  ;;  %v591_v10 = vmul.f32 %v1250_v23, %v1842_v28 }
 0x1b8   : > { %v607_v59 = vpack.c.bf16 %v591_v10, %v590_v20  ;;  %v1261_v10 = vld [vmem:[%s1552_s29 + $0x50] sm:$0xff] }
 0x1ba   : > { %1097 = vmatmul.mubr.bf16.gmra.mxu1 %v607_v59 }
 0x246   : > { %v1070_v58 = vpop.f32.mrf.mxu0 }
 0x247   : > { %v722_v26 = vadd.f32 %v1070_v58, %v1885_v24 }
 0x248   : > { %v713_v29 = vpop.f32.mrf.mxu0 }
 0x249   : > { %v842_v62 = vadd.f32 %v722_v26, %v1579_v4  ;;  %v714_v60 = vadd.f32 %v1885_v24, %v713_v29 }
 0x24a   : > { %v1071_v43 = vpop.f32.mrf.mxu0  ;;  %v1086_v34 = vpop.f32.mrf.mxu1 }
 0x24b   : > { %874 = vst [vmem:[%s1892_s17 + $0x10] sm:$0xff] %v842_v62  ;;  %v840_v28 = vadd.f32 %v1251_v7, %v714_v60  ;;  %v725_v63 = vadd.f32 %v1071_v43, %v1885_v24  ;;  %v786_v4 = vadd.f32 %v1086_v34, %v1885_v24  ;;  %v1262_v62 = vld [vmem:[%s1552_s29 + $0x40] sm:$0xff] }
 0x24c   : > { %v716_v35 = vpop.f32.mrf.mxu0  ;;  %v777_v39 = vpop.f32.mrf.mxu1 }
 0x24d   : > { %872 = vst [vmem:[%s1892_s17] sm:$0xff] %v840_v28  ;;  %v843_v30 = vadd.f32 %v725_v63, %v1582_v5  ;;  %v858_v40 = vadd.f32 %v786_v4, %v1587_v6  ;;  %v717_v8 = vadd.f32 %v1885_v24, %v716_v35  ;;  %v778_v37 = vadd.f32 %v1885_v24, %v777_v39  ;;  %v1254_v5 = vld [vmem:[%s1552_s29 + $0x98] sm:$0xff]  ;;  %v1264_v35 = vld [vmem:[%s1552_s29 + $0xd0] sm:$0xff] }
 0x24e   : > { %v1087_v38 = vpop.f32.mrf.mxu1  ;;  %v1263_v63 = vld [vmem:[%s1552_s29 + $0x58] sm:$0xff] }
 0x24f   : > { %875 = vst [vmem:[%s1892_s17 + $0x18] sm:$0xff] %v843_v30  ;;  %890 = vst [vmem:[%s1892_s17 + $0x90] sm:$0xff] %v858_v40  ;;  %v841_v42 = vadd.f32 %v1252_v32, %v717_v8  ;;  %v856_v15 = vadd.f32 %v1253_v33, %v778_v37  ;;  %v789_v45 = vadd.f32 %v1087_v38, %v1885_v24  ;;  %v1265_v37 = vld [vmem:[%s1552_s29 + $0x48] sm:$0xff]  ;;  %v1266_v32 = vld [vmem:[%s1552_s29 + $0xc0] sm:$0xff] }
 0x250   : > { %v780_v31 = vpop.f32.mrf.mxu1 }
 0x251   : > { %873 = vst [vmem:[%s1892_s17 + $0x8] sm:$0xff] %v841_v42  ;;  %888 = vst [vmem:[%s1892_s17 + $0x80] sm:$0xff] %v856_v15  ;;  %v859_v6 = vadd.f32 %v1254_v5, %v789_v45  ;;  %v781_v44 = vadd.f32 %v1885_v24, %v780_v31  ;;  %v1267_v45 = vld [vmem:[%s1552_s29 + $0xd8] sm:$0xff] }
 0x253   : > { %891 = vst [vmem:[%s1892_s17 + $0x98] sm:$0xff] %v859_v6  ;;  %v857_v16 = vadd.f32 %v1255_v46, %v781_v44  ;;  %v1268_v6 = vld [vmem:[%s1552_s29 + $0xc8] sm:$0xff] }
 0x255   : > { %889 = vst [vmem:[%s1892_s17 + $0x88] sm:$0xff] %v857_v16 }
 0x256   : > { %v1074_v48 = vpop.f32.mrf.mxu0 }
 0x257   : > { %v738_v47 = vadd.f32 %v1074_v48, %v1885_v24 }
 0x258   : > { %v729_v49 = vpop.f32.mrf.mxu0 }
 0x259   : > { %v846_v25 = vadd.f32 %v738_v47, %v1611_v12  ;;  %v730_v41 = vadd.f32 %v1885_v24, %v729_v49  ;;  %v1269_v47 = vld [vmem:[%s1552_s29 + $0x70] sm:$0xff] }
 0x25a   : > { %v1075_v17 = vpop.f32.mrf.mxu0  ;;  %v1090_v51 = vpop.f32.mrf.mxu1 }
 0x25b   : > { %878 = vst [vmem:[%s1892_s17 + $0x30] sm:$0xff] %v846_v25  ;;  %v844_v53 = vadd.f32 %v1256_v9, %v730_v41  ;;  %v741_v54 = vadd.f32 %v1075_v17, %v1885_v24  ;;  %v802_v56 = vadd.f32 %v1090_v51, %v1885_v24  ;;  %v1270_v51 = vld [vmem:[%s1552_s29 + $0x60] sm:$0xff] }
 0x25c   : > { %v732_v55 = vpop.f32.mrf.mxu0  ;;  %v793_v18 = vpop.f32.mrf.mxu1 }
 0x25d   : > { %876 = vst [vmem:[%s1892_s17 + $0x20] sm:$0xff] %v844_v53  ;;  %v847_v12 = vadd.f32 %v741_v54, %v1614_v13  ;;  %v862_v19 = vadd.f32 %v802_v56, %v1619_v14  ;;  %v733_v52 = vadd.f32 %v1885_v24, %v732_v55  ;;  %v794_v57 = vadd.f32 %v1885_v24, %v793_v18  ;;  %v1259_v14 = vld [vmem:[%s1552_s29 + $0xb8] sm:$0xff] }
 0x25e   : > { %v1091_v27 = vpop.f32.mrf.mxu1  ;;  %v1271_v18 = vld [vmem:[%s1552_s29 + $0x78] sm:$0xff] }
 0x25f   : > { %879 = vst [vmem:[%s1892_s17 + $0x38] sm:$0xff] %v847_v12  ;;  %894 = vst [vmem:[%s1892_s17 + $0xb0] sm:$0xff] %v862_v19  ;;  %v845_v0 = vadd.f32 %v1257_v61, %v733_v52  ;;  %v860_v3 = vadd.f32 %v1258_v50, %v794_v57  ;;  %v805_v11 = vadd.f32 %v1091_v27, %v1885_v24  ;;  %v1272_v19 = vld [vmem:[%s1552_s29 + $0xf0] sm:$0xff] }
 0x260   : > { %v796_v13 = vpop.f32.mrf.mxu1 }
 0x261   : > { %877 = vst [vmem:[%s1892_s17 + $0x28] sm:$0xff] %v845_v0  ;;  %892 = vst [vmem:[%s1892_s17 + $0xa0] sm:$0xff] %v860_v3  ;;  %v863_v21 = vadd.f32 %v1259_v14, %v805_v11  ;;  %v797_v1 = vadd.f32 %v1885_v24, %v796_v13  ;;  %v1273_v0 = vld [vmem:[%s1552_s29 + $0x68] sm:$0xff]  ;;  %v1274_v3 = vld [vmem:[%s1552_s29 + $0xe0] sm:$0xff] }
 0x263   : > { %895 = vst [vmem:[%s1892_s17 + $0xb8] sm:$0xff] %v863_v21  ;;  %v861_v36 = vadd.f32 %v1260_v2, %v797_v1  ;;  %v1275_v21 = vld [vmem:[%s1552_s29 + $0xf8] sm:$0xff] }
 0x265   : > { %893 = vst [vmem:[%s1892_s17 + $0xa8] sm:$0xff] %v861_v36  ;;  %v1276_v36 = vld [vmem:[%s1552_s29 + $0xe8] sm:$0xff] }
 0x266   : > { %v1078_v22 = vpop.f32.mrf.mxu0 }
 0x267   : > { %v754_v23 = vadd.f32 %v1078_v22, %v1885_v24 }
 0x268   : > { %v745_v20 = vpop.f32.mrf.mxu0 }
 0x269   : > { %v850_v59 = vadd.f32 %v1261_v10, %v754_v23  ;;  %v746_v58 = vadd.f32 %v1885_v24, %v745_v20 }
 0x26a   : > { %v1079_v26 = vpop.f32.mrf.mxu0  ;;  %v1094_v29 = vpop.f32.mrf.mxu1 }
 0x26b   : > { %882 = vst [vmem:[%s1892_s17 + $0x50] sm:$0xff] %v850_v59  ;;  %v848_v60 = vadd.f32 %v1262_v62, %v746_v58  ;;  %v757_v43 = vadd.f32 %v1079_v26, %v1885_v24  ;;  %v818_v34 = vadd.f32 %v1094_v29, %v1885_v24 }
 0x26c   : > { %v748_v7 = vpop.f32.mrf.mxu0  ;;  %v809_v28 = vpop.f32.mrf.mxu1 }
 0x26d   : > { %880 = vst [vmem:[%s1892_s17 + $0x40] sm:$0xff] %v848_v60  ;;  %v851_v4 = vadd.f32 %v1263_v63, %v757_v43  ;;  %v866_v39 = vadd.f32 %v1264_v35, %v818_v34  ;;  %v749_v30 = vadd.f32 %v1885_v24, %v748_v7  ;;  %v810_v40 = vadd.f32 %v1885_v24, %v809_v28 }
 0x26e   : > { %v1095_v8 = vpop.f32.mrf.mxu1 }
 0x26f   : > { %883 = vst [vmem:[%s1892_s17 + $0x58] sm:$0xff] %v851_v4  ;;  %898 = vst [vmem:[%s1892_s17 + $0xd0] sm:$0xff] %v866_v39  ;;  %v849_v38 = vadd.f32 %v1265_v37, %v749_v30  ;;  %v864_v42 = vadd.f32 %v1266_v32, %v810_v40  ;;  %v821_v33 = vadd.f32 %v1095_v8, %v1885_v24 }
 0x270   : > { %v812_v15 = vpop.f32.mrf.mxu1 }
 0x271   : > { %881 = vst [vmem:[%s1892_s17 + $0x48] sm:$0xff] %v849_v38  ;;  %896 = vst [vmem:[%s1892_s17 + $0xc0] sm:$0xff] %v864_v42  ;;  %v867_v31 = vadd.f32 %v1267_v45, %v821_v33  ;;  %v813_v5 = vadd.f32 %v1885_v24, %v812_v15 }
 0x273   : > { %899 = vst [vmem:[%s1892_s17 + $0xd8] sm:$0xff] %v867_v31  ;;  %v865_v44 = vadd.f32 %v1268_v6, %v813_v5 }
 0x275   : > { %897 = vst [vmem:[%s1892_s17 + $0xc8] sm:$0xff] %v865_v44 }
 0x276   : > { %v1082_v46 = vpop.f32.mrf.mxu0 }
 0x277   : > { %v770_v16 = vadd.f32 %v1082_v46, %v1885_v24 }
 0x278   : > { %v761_v48 = vpop.f32.mrf.mxu0 }
 0x279   : > { %v854_v49 = vadd.f32 %v1269_v47, %v770_v16  ;;  %v762_v25 = vadd.f32 %v1885_v24, %v761_v48 }
 0x27a   : > { %v1083_v41 = vpop.f32.mrf.mxu0  ;;  %v1098_v17 = vpop.f32.mrf.mxu1 }
 0x27b   : > { %886 = vst [vmem:[%s1892_s17 + $0x70] sm:$0xff] %v854_v49  ;;  %v852_v9 = vadd.f32 %v1270_v51, %v762_v25  ;;  %v773_v53 = vadd.f32 %v1083_v41, %v1885_v24  ;;  %v834_v54 = vadd.f32 %v1098_v17, %v1885_v24 }
 0x27c   : > { %v764_v56 = vpop.f32.mrf.mxu0  ;;  %v825_v55 = vpop.f32.mrf.mxu1 }
 0x27d   : > { %884 = vst [vmem:[%s1892_s17 + $0x60] sm:$0xff] %v852_v9  ;;  %v855_v12 = vadd.f32 %v1271_v18, %v773_v53  ;;  %v870_v52 = vadd.f32 %v1272_v19, %v834_v54  ;;  %v765_v57 = vadd.f32 %v1885_v24, %v764_v56  ;;  %v826_v27 = vadd.f32 %v1885_v24, %v825_v55 }
 0x27e   : > { %v1099_v61 = vpop.f32.mrf.mxu1 }
 0x27f   : > { %887 = vst [vmem:[%s1892_s17 + $0x78] sm:$0xff] %v855_v12  ;;  %902 = vst [vmem:[%s1892_s17 + $0xf0] sm:$0xff] %v870_v52  ;;  %v853_v50 = vadd.f32 %v1273_v0, %v765_v57  ;;  %v868_v11 = vadd.f32 %v1274_v3, %v826_v27  ;;  %v837_v13 = vadd.f32 %v1099_v61, %v1885_v24 }
 0x280   : > { %v828_v14 = vpop.f32.mrf.mxu1 }
 0x281   : > { %885 = vst [vmem:[%s1892_s17 + $0x68] sm:$0xff] %v853_v50  ;;  %900 = vst [vmem:[%s1892_s17 + $0xe0] sm:$0xff] %v868_v11  ;;  %v871_v1 = vadd.f32 %v1275_v21, %v837_v13  ;;  %v829_v2 = vadd.f32 %v1885_v24, %v828_v14 }
 0x283   : > { %903 = vst [vmem:[%s1892_s17 + $0xf8] sm:$0xff] %v871_v1  ;;  %v869_v22 = vadd.f32 %v1276_v36, %v829_v2 }
 0x285   : > { %901 = vst [vmem:[%s1892_s17 + $0xe8] sm:$0xff] %v869_v22 }
 0x286   : > { %1344 = shalt.err (!%p1341_p0)
}
 0x287   : > { %s1345_s11 = scalar_lea.hbm %s1989_s4, 4096  ;;  %s1349_s28 = scalar_lea.hbm %s2040_s3, 8192 }
 0x288   : > { %p1346_p5 = scmp.ne.s32.totalorder %s1989_s4, %s1345_s11  ;;  %p1350_p4 = scmp.lt.s32.totalorder %s1989_s4, %s2040_s3 }
 0x289   : > { %p1351_p6 = scmp.lt.s32.totalorder %s1349_s28, %s1345_s11 }
 0x28a   : > { %p1347_p9 = pnand %p1346_p5, %p2056_p11 }
 0x28b   : > { %p1352_p8 = por %p1351_p6, %p1350_p4 }
 0x28c   : > { %p1348_p1 = pneg %p1347_p9 }
 0x28e   : > { %p1353_p3 = pnand %p1352_p8, %p1348_p1 }
 0x290   : > { %1356 = shalt.err (!%p1353_p3)
}
 0x291   : > { %s1408_s20 = smov 128   ;;  %s1409_s17 = smov 8  }
 0x292   : > { %1122 = dma.vmem_to_hbm [thread:$0]  (%p2056_p11), %s1991_s23, 4096, %s1989_s4, %s905_s16, %s1408_s20, %s1408_s20, %s1409_s17  }
 0x293 PF: > { %s933_s22 = sand.u32 1, %s1387_s12   ;;  %p2057_p7 = scmp.ne.s32.totalorder %s2046_s19, 0 }
 0x294   : > { %p2058_p12 = scmp.ge.s32.totalorder %s1399_s15, 2  ;;  %s934_s25 = scalar_lea.sflag [#allocation4], %s933_s22 }
 0x296   : > { %p1133_p10 = pnand %p2058_p12, %p2057_p7 }
 0x298   : > { %p1134_p2 = pneg %p1133_p10 }
 0x29a   : > { %1382 = dma.done.wait (%p1134_p2), %s934_s25, 4096  }
 0x29b   : > { %1384 = vsyncadd (%p1134_p2), %s934_s25, 4294963200  ;;  %p17_p13 = scmp.ge.s32.totalorder %s1484_s24, 4   ;;  %s2059_s12 = smov %s1391_s13 }
 0x29c   : > { %s2060_s13 = smov %s1395_s14  ;;  %s2061_s14 = smov %s1501_s5 }
 0x29d   : > { %s2062_s15 = smov %s1484_s24  ;;  %19 = sbr.rel (!%p17_p13) target bundleno = 6 (0x6), region = 81 }
 0x2a2   :  { %939 = vsyncpa [#allocation3], 1 }
 0x2a3   :  { %941 = vsyncpa [#allocation3 + $0x1], 1 }
 0x2a4   :  { %942 = vsyncpa [#allocation6], 1 }
 0x2a5   :  { %943 = vsyncpa [#allocation4], 1 }
 0x2a6   :  { %945 = vsyncpa [#allocation4 + $0x1], 1 }

</bundles_post_ra>
